<compile_context>
chip_gen: v7x
topology: tpu7x:2x2x1
jax: 0.10.0
libtpu: 0.0.40
codegen_flags: <defaults>
</compile_context>

<pallas_src>
import math

import numpy as np
import jax
import jax.numpy as jnp
from jax.experimental import pallas as pl
from jax.experimental.pallas import tpu as pltpu

# ----------------------------- config (small, deterministic) -----------------
SEQ_LEN = 32
D_MODEL = 16
D_FF = 32
DOWN_SAMPLING_WINDOW = 2
DOWN_SAMPLING_LAYERS = 2
BATCH = 2
E_LAYERS = 2                       # number of stacked TrendPastDecomposableMixing blocks

KSIZE = 25                         # series_decomp moving-average kernel
PAD = (KSIZE - 1) // 2             # 12, replicate padding on both sides

# per-scale sequence lengths and their row offsets in the fused time slab
T0 = SEQ_LEN                                   # 32
T1 = SEQ_LEN // DOWN_SAMPLING_WINDOW           # 16
T2 = SEQ_LEN // DOWN_SAMPLING_WINDOW ** 2      # 8
T_TOTAL = T0 + T1 + T2                         # 56
PADT = 64                                      # padded slab rows (multiple of 8)
OFF1, OFF2 = T0, T0 + T1                       # scale-1 / scale-2 row offsets

N_LANE = BATCH * D_MODEL                       # 32  (batch x channel folded into lanes)
BF_LANE = BATCH * D_FF                         # 64

# packed time-mix weight layout (biases folded in as the last column; the
# matching input slab gets an extra ones-row appended in-kernel)
TW_W1A_ROW = 0                                 # W1a_aug [T1, T2+1]
TW_W2A_ROW = T1                                # W2a_aug [T1, T1+1]
TW_W1B_ROW = 2 * T1                            # W1b_aug [T0, T1+1]
TW_W2B_ROW = 2 * T1 + T0                       # W2b_aug [T0, T0+1]
TW_R = TW_W2B_ROW + T0                         # 96
TW_C = 64

# packed channel-MLP weight layout (block-diagonal over the batch so the MLP
# runs once on the whole [PADT, B*C] slab without any in-kernel reshape)
CW_W1_ROW = 0                                  # OW1_big [N_LANE, BF_LANE]
CW_B1_ROW = N_LANE                             # OB1_big [1, BF_LANE]
CW_W2_ROW = ((CW_B1_ROW + 1 + 7) // 8) * 8     # 40: OW2_big [BF_LANE, N_LANE]
CW_B2_ROW = CW_W2_ROW + BF_LANE                # 104: OB2_big [1, N_LANE]
CW_R = ((CW_B2_ROW + 1 + 7) // 8) * 8          # 112
CW_C = 64


# ----------------------------- in-kernel helpers ------------------------------
def _gelu(x):
    # tanh-form GELU (EUP tanh instead of a VALU erf polynomial); differs from
    # torch's exact-erf GELU by <~1e-3 absolute.
    c = 0.7978845608028654  # sqrt(2/pi)
    return 0.5 * x * (1.0 + jnp.tanh(c * (x + 0.044715 * x * x * x)))


# ----------------------------- fused Pallas kernel ----------------------------
def _pdm_stack_kernel(x_ref, a_ref, tw_ref, cw_ref, o_ref, state_ref):
    """One grid step == one TrendPastDecomposableMixing layer on the fused slab."""
    f32 = jnp.float32
    j = pl.program_id(0)

    # layer 0 reads the input slab; later layers read the carried VMEM state
    @pl.when(j == 0)
    def _():
        state_ref[...] = x_ref[...]

    x = state_ref[...]                     # [PADT, N_LANE]
    tw = tw_ref[0]                         # [TW_R, TW_C]  packed time-mix weights
    cw = cw_ref[0]                         # [CW_R, CW_C]  packed channel-MLP weights

    # ---- series_decomp for all 3 scales at once: block-diagonal MA matmul
    trend = jnp.dot(a_ref[...], x, preferred_element_type=f32)
    season = x - trend
    tr0 = trend[0:T0]                      # [T0, N]
    tr1 = trend[OFF1:OFF1 + T1]            # [T1, N]
    tr2 = trend[OFF2:OFF2 + T2]            # [T2, N]

    ones_row = jnp.ones((1, N_LANE), f32)

    def aug(z):                            # fold the bias via an augmented ones-row
        return jnp.concatenate([z, ones_row], axis=0)

    # ---- top-down trend mixing (TrendMultiScaleTrendMixing), biases folded in
    w1a = tw[TW_W1A_ROW:TW_W1A_ROW + T1, 0:T2 + 1]
    w2a = tw[TW_W2A_ROW:TW_W2A_ROW + T1, 0:T1 + 1]
    w1b = tw[TW_W1B_ROW:TW_W1B_ROW + T0, 0:T1 + 1]
    w2b = tw[TW_W2B_ROW:TW_W2B_ROW + T0, 0:T0 + 1]

    h = _gelu(jnp.dot(w1a, aug(tr2), preferred_element_type=f32))
    mixed1 = tr1 + jnp.dot(w2a, aug(h), preferred_element_type=f32)
    h = _gelu(jnp.dot(w1b, aug(mixed1), preferred_element_type=f32))
    mixed0 = tr0 + jnp.dot(w2b, aug(h), preferred_element_type=f32)

    # out_trend_list (after the reference's reverse) == [mixed0, mixed1, tr2]
    mixed = jnp.concatenate(
        [mixed0, mixed1, tr2, jnp.zeros((PADT - T_TOTAL, N_LANE), f32)], axis=0)

    # NOTE: the reference's bottom-up season mixing never reaches the output
    # (the output loop uses the raw season residual); intentionally omitted.

    # ---- out = ori + out_cross_layer_test(out_trend + season), one pass on the slab
    z = mixed + season
    ow1 = cw[CW_W1_ROW:CW_W1_ROW + N_LANE, 0:BF_LANE]
    ob1 = cw[CW_B1_ROW:CW_B1_ROW + 1, 0:BF_LANE]
    ow2 = cw[CW_W2_ROW:CW_W2_ROW + BF_LANE, 0:N_LANE]
    ob2 = cw[CW_B2_ROW:CW_B2_ROW + 1, 0:N_LANE]
    hc = _gelu(jnp.dot(z, ow1, preferred_element_type=f32) + ob1)
    y = jnp.dot(hc, ow2, preferred_element_type=f32) + ob2

    # keep the pad rows at zero so they never pollute later layers
    row = jax.lax.broadcasted_iota(jnp.int32, (PADT, N_LANE), 0)
    new_x = jnp.where(row < T_TOTAL, x + y, 0.0)
    state_ref[...] = new_x

    @pl.when(j == pl.num_programs(0) - 1)
    def _():
        o_ref[...] = new_x


# ----------------------------- host-side packing helpers ----------------------
def _avg_block(T):
    """(T, T) moving-average matrix with replicate-edge padding folded in."""
    A = np.zeros((T, T), dtype=np.float32)
    for t in range(T):
        for k in range(-PAD, PAD + 1):
            A[t, min(max(t + k, 0), T - 1)] += 1.0
    return A / np.float32(KSIZE)


def build_avg_matrix():
    """Block-diagonal MA matrix over the fused [PADT]-row slab (zeros for pad rows)."""
    A = np.zeros((PADT, PADT), dtype=np.float32)
    off = 0
    for T in (T0, T1, T2):
        A[off:off + T, off:off + T] = _avg_block(T)
        off += T
    return jnp.asarray(A)


def pack_time_weights(w1a, b1a, w2a, b2a, w1b, b1b, w2b, b2b):
    tw = jnp.zeros((TW_R, TW_C), jnp.float32)
    tw = tw.at[TW_W1A_ROW:TW_W1A_ROW + T1, 0:T2 + 1].set(
        jnp.concatenate([w1a, b1a[:, None]], axis=1))
    tw = tw.at[TW_W2A_ROW:TW_W2A_ROW + T1, 0:T1 + 1].set(
        jnp.concatenate([w2a, b2a[:, None]], axis=1))
    tw = tw.at[TW_W1B_ROW:TW_W1B_ROW + T0, 0:T1 + 1].set(
        jnp.concatenate([w1b, b1b[:, None]], axis=1))
    tw = tw.at[TW_W2B_ROW:TW_W2B_ROW + T0, 0:T0 + 1].set(
        jnp.concatenate([w2b, b2b[:, None]], axis=1))
    return tw


def pack_channel_weights(ow1, ob1, ow2, ob2):
    ow1_big = jnp.zeros((N_LANE, BF_LANE), jnp.float32)
    ow2_big = jnp.zeros((BF_LANE, N_LANE), jnp.float32)
    for b in range(BATCH):
        ow1_big = ow1_big.at[b * D_MODEL:(b + 1) * D_MODEL,
                             b * D_FF:(b + 1) * D_FF].set(ow1)
        ow2_big = ow2_big.at[b * D_FF:(b + 1) * D_FF,
                             b * D_MODEL:(b + 1) * D_MODEL].set(ow2)
    cw = jnp.zeros((CW_R, CW_C), jnp.float32)
    cw = cw.at[CW_W1_ROW:CW_W1_ROW + N_LANE, 0:BF_LANE].set(ow1_big)
    cw = cw.at[CW_B1_ROW, 0:BF_LANE].set(jnp.tile(ob1, BATCH))
    cw = cw.at[CW_W2_ROW:CW_W2_ROW + BF_LANE, 0:N_LANE].set(ow2_big)
    cw = cw.at[CW_B2_ROW, 0:N_LANE].set(jnp.tile(ob2, BATCH))
    return cw


def pack_inputs(x_list):
    """x_list: 3 arrays [B, T_i, C] -> fused slab [PADT, B*C] (time rows, (b,c) lanes)."""
    slabs = []
    for x in x_list:
        B, T, C = x.shape
        slabs.append(jnp.transpose(x, (1, 0, 2)).reshape(T, B * C))
    slabs.append(jnp.zeros((PADT - T_TOTAL, N_LANE), jnp.float32))
    return jnp.concatenate(slabs, axis=0)


def unpack_outputs(out_cat):
    out = jnp.transpose(out_cat.reshape(PADT, BATCH, D_MODEL), (1, 0, 2))
    return [out[:, 0:T0, :], out[:, OFF1:OFF1 + T1, :], out[:, OFF2:OFF2 + T2, :]]


# ----------------------------- wrapper ----------------------------------------
def trend_pdm_stack_forward(x_list, tw_stack, cw_stack, avg_mat):
    """Apply E_LAYERS TrendPastDecomposableMixing blocks; returns list like x_list."""
    xcat = pack_inputs(x_list)
    n_layers = tw_stack.shape[0]
    out_cat = pl.pallas_call(
        _pdm_stack_kernel,
        out_shape=jax.ShapeDtypeStruct((PADT, N_LANE), jnp.float32),
        grid=(n_layers,),
        in_specs=[
            pl.BlockSpec((PADT, N_LANE), lambda j: (0, 0)),      # fused input slab
            pl.BlockSpec((PADT, PADT), lambda j: (0, 0)),        # block-diag MA matrix
            pl.BlockSpec((1, TW_R, TW_C), lambda j: (j, 0, 0)),  # per-layer time-mix pack
            pl.BlockSpec((1, CW_R, CW_C), lambda j: (j, 0, 0)),  # per-layer channel-MLP pack
        ],
        out_specs=pl.BlockSpec((PADT, N_LANE), lambda j: (0, 0)),
        scratch_shapes=[pltpu.VMEM((PADT, N_LANE), jnp.float32)],
        compiler_params=pltpu.CompilerParams(dimension_semantics=("arbitrary",)),
    )(xcat, avg_mat, tw_stack, cw_stack)
    return unpack_outputs(out_cat)


# ----------------------------- parameters --------------------------------------
def init_params(key, n_layers):
    """Returns (tw_stack [L,TW_R,TW_C], cw_stack [L,CW_R,CW_C], raw per-layer params)."""
    tws, cws, raw = [], [], []
    for _ in range(n_layers):
        key, *ks = jax.random.split(key, 13)

        def lin(k, fan_in, shape):
            bound = 1.0 / math.sqrt(fan_in)
            return jax.random.uniform(k, shape, jnp.float32, -bound, bound)

        # up_sampling_layers[0]: T2 -> T1 (left-matmul layout W[out, in])
        w1a, b1a = lin(ks[0], T2, (T1, T2)), lin(ks[1], T2, (T1,))
        w2a, b2a = lin(ks[2], T1, (T1, T1)), lin(ks[3], T1, (T1,))
        # up_sampling_layers[1]: T1 -> T0
        w1b, b1b = lin(ks[4], T1, (T0, T1)), lin(ks[5], T1, (T0,))
        w2b, b2b = lin(ks[6], T0, (T0, T0)), lin(ks[7], T0, (T0,))
        # out_cross_layer_test channel MLP (right-matmul layout W[in, out])
        ow1, ob1 = lin(ks[8], D_MODEL, (D_MODEL, D_FF)), lin(ks[9], D_MODEL, (D_FF,))
        ow2, ob2 = lin(ks[10], D_FF, (D_FF, D_MODEL)), lin(ks[11], D_FF, (D_MODEL,))

        tws.append(pack_time_weights(w1a, b1a, w2a, b2a, w1b, b1b, w2b, b2b))
        cws.append(pack_channel_weights(ow1, ob1, ow2, ob2))
        raw.append((w1a, b1a, w2a, b2a, w1b, b1b, w2b, b2b, ow1, ob1, ow2, ob2))
    return jnp.stack(tws), jnp.stack(cws), raw


# ----------------------------- pure-JAX reference (for verification) -----------
def _ref_moving_avg(x):
    front = jnp.repeat(x[:, :1, :], PAD, axis=1)
    end = jnp.repeat(x[:, -1:, :], PAD, axis=1)
    xp = jnp.concatenate([front, x, end], axis=1)
    return jnp.stack([jnp.mean(xp[:, t:t + KSIZE, :], axis=1)
                      for t in range(x.shape[1])], axis=1)


def reference_forward(x_list, raw_params):
    xs = list(x_list)
    hi = jax.lax.Precision.HIGHEST
    for (w1a, b1a, w2a, b2a, w1b, b1b, w2b, b2b, ow1, ob1, ow2, ob2) in raw_params:
        trends, seasons = [], []
        for x in xs:
            mv = _ref_moving_avg(x)
            trends.append(mv)
            seasons.append(x - mv)
        tr0, tr1, tr2 = trends

        def tmix(z, w, b):  # Linear over the time axis on [B, T, C]
            return jnp.einsum('btc,ot->boc', z, w, precision=hi) + b[None, :, None]

        h = _gelu(tmix(tr2, w1a, b1a))
        mixed1 = tr1 + tmix(h, w2a, b2a)
        h = _gelu(tmix(mixed1, w1b, b1b))
        mixed0 = tr0 + tmix(h, w2b, b2b)

        outs = []
        for x, m, s in zip(xs, (mixed0, mixed1, tr2), seasons):
            z = m + s
            hh = _gelu(jnp.einsum('btc,cf->btf', z, ow1, precision=hi) + ob1)
            y = jnp.einsum('btf,fc->btc', hh, ow2, precision=hi) + ob2
            outs.append(x + y)
        xs = outs
    return xs


# ----------------------------- main ----------------------------------------------
if __name__ == "__main__":
    key = jax.random.PRNGKey(0)
    kp, kx = jax.random.split(key)
    tw_stack, cw_stack, raw_params = init_params(kp, E_LAYERS)
    avg_mat = build_avg_matrix()

    x_keys = jax.random.split(kx, DOWN_SAMPLING_LAYERS + 1)
    x_list = tuple(
        jax.random.normal(
            x_keys[i],
            (BATCH, SEQ_LEN // DOWN_SAMPLING_WINDOW ** i, D_MODEL),
            jnp.float32,
        )
        for i in range(DOWN_SAMPLING_LAYERS + 1)
    )

    fwd = jax.jit(trend_pdm_stack_forward)
    out_list = jax.block_until_ready(fwd(x_list, tw_stack, cw_stack, avg_mat))

    ref_list = reference_forward(x_list, raw_params)
    for x, o, r in zip(x_list, out_list, ref_list):
        assert o.shape == x.shape and o.dtype == jnp.float32
        assert bool(jnp.all(jnp.isfinite(o)))
        err = float(jnp.max(jnp.abs(o - r)))
        assert err < 2e-3, f"mismatch vs reference: {err}"

    print("KERNEL_OK")
</pallas_src>

<mosaic_0001>
module attributes {stable_mosaic.version = 11 : i64} {
  func.func @_pdm_stack_kernel(%arg0: i32, %arg1: memref<64x32xf32, #tpu.memory_space<vmem>>, %arg2: memref<64x64xf32, #tpu.memory_space<vmem>>, %arg3: memref<1x96x64xf32, #tpu.memory_space<vmem>>, %arg4: memref<1x112x64xf32, #tpu.memory_space<vmem>>, %arg5: memref<64x32xf32, #tpu.memory_space<vmem>>, %arg6: memref<64x32xf32, #tpu.memory_space<vmem>>) attributes {dimension_semantics = [#tpu.dimension_semantics<arbitrary>], iteration_bounds = array<i64: 2>, scalar_prefetch = 0 : i64, scratch_operands = 1 : i64, tpu.core_type = #tpu.core_type<tc>, window_params = [{pipeline_mode = #tpu.pipeline_mode<synchronous>, transform_indices = @transform_0, window_bounds = array<i64: 64, 32>}, {pipeline_mode = #tpu.pipeline_mode<synchronous>, transform_indices = @transform_1, window_bounds = array<i64: 64, 64>}, {transform_indices = @transform_2, window_bounds = array<i64: 1, 96, 64>}, {transform_indices = @transform_3, window_bounds = array<i64: 1, 112, 64>}, {pipeline_mode = #tpu.pipeline_mode<synchronous>, transform_indices = @transform_4, window_bounds = array<i64: 64, 32>}]} {
    %c0_i32 = arith.constant 0 : i32
    %0 = arith.cmpi eq, %arg0, %c0_i32 : i32
    %1 = arith.extui %0 : i1 to i32
    %c0_i32_0 = arith.constant 0 : i32
    %2 = arith.cmpi ne, %1, %c0_i32_0 : i32
    scf.if %2 {
      %c0_34 = arith.constant 0 : index
      %c0_35 = arith.constant 0 : index
      %91 = vector.load %arg1[%c0_34, %c0_35] : memref<64x32xf32, #tpu.memory_space<vmem>>, vector<64x32xf32>
      %c0_36 = arith.constant 0 : index
      %c0_37 = arith.constant 0 : index
      %92 = vector.load %arg6[%c0_36, %c0_37] : memref<64x32xf32, #tpu.memory_space<vmem>>, vector<64x32xf32>
      tpu.vector_store %arg6[%c0_36, %c0_37], %91 {strides = array<i32>} : memref<64x32xf32, #tpu.memory_space<vmem>>, vector<64x32xf32>,
    } else {
    }
    %c0 = arith.constant 0 : index
    %c0_1 = arith.constant 0 : index
    %3 = vector.load %arg6[%c0, %c0_1] : memref<64x32xf32, #tpu.memory_space<vmem>>, vector<64x32xf32>
    %c0_2 = arith.constant 0 : index
    %c0_3 = arith.constant 0 : index
    %c0_4 = arith.constant 0 : index
    %4 = vector.load %arg3[%c0_2, %c0_3, %c0_4] : memref<1x96x64xf32, #tpu.memory_space<vmem>>, vector<1x96x64xf32>
    %5 = vector.shape_cast %4 : vector<1x96x64xf32> to vector<96x64xf32>
    %c0_5 = arith.constant 0 : index
    %c0_6 = arith.constant 0 : index
    %c0_7 = arith.constant 0 : index
    %6 = vector.load %arg4[%c0_5, %c0_6, %c0_7] : memref<1x112x64xf32, #tpu.memory_space<vmem>>, vector<1x112x64xf32>
    %7 = vector.shape_cast %6 : vector<1x112x64xf32> to vector<112x64xf32>
    %c0_8 = arith.constant 0 : index
    %c0_9 = arith.constant 0 : index
    %8 = vector.load %arg2[%c0_8, %c0_9] : memref<64x64xf32, #tpu.memory_space<vmem>>, vector<64x64xf32>
    %cst = arith.constant dense<0.000000e+00> : vector<64x32xf32>
    %9 = tpu.matmul %8, %3, %cst {dimension_numbers = #tpu.dot_dimension_numbers<[1], [0], [0], [1], [0, 0, 1, 1], [], []>} : vector<64x64xf32>, vector<64x32xf32>, vector<64x32xf32> -> vector<64x32xf32>
    %10 = arith.subf %3, %9 : vector<64x32xf32>
    %11 = vector.extract_strided_slice %9 {offsets = [0, 0], sizes = [32, 32], strides = [1, 1]} : vector<64x32xf32> to vector<32x32xf32>
    %12 = vector.extract_strided_slice %9 {offsets = [32, 0], sizes = [16, 32], strides = [1, 1]} : vector<64x32xf32> to vector<16x32xf32>
    %13 = vector.extract_strided_slice %9 {offsets = [48, 0], sizes = [8, 32], strides = [1, 1]} : vector<64x32xf32> to vector<8x32xf32>
    %cst_10 = arith.constant 1.000000e+00 : f32
    %14 = vector.broadcast %cst_10 : f32 to vector<1x32xf32>
    %15 = vector.extract_strided_slice %5 {offsets = [0, 0], sizes = [16, 9], strides = [1, 1]} : vector<96x64xf32> to vector<16x9xf32>
    %16 = vector.extract_strided_slice %5 {offsets = [16, 0], sizes = [16, 17], strides = [1, 1]} : vector<96x64xf32> to vector<16x17xf32>
    %17 = vector.extract_strided_slice %5 {offsets = [32, 0], sizes = [32, 17], strides = [1, 1]} : vector<96x64xf32> to vector<32x17xf32>
    %18 = vector.extract_strided_slice %5 {offsets = [64, 0], sizes = [32, 33], strides = [1, 1]} : vector<96x64xf32> to vector<32x33xf32>
    %19 = tpu.concatenate %13, %14 in 0 : vector<8x32xf32>, vector<1x32xf32> -> vector<9x32xf32>
    %cst_11 = arith.constant dense<0.000000e+00> : vector<16x32xf32>
    %20 = tpu.matmul %15, %19, %cst_11 {dimension_numbers = #tpu.dot_dimension_numbers<[1], [0], [0], [1], [0, 0, 1, 1], [], []>} : vector<16x9xf32>, vector<9x32xf32>, vector<16x32xf32> -> vector<16x32xf32>
    %cst_12 = arith.constant 5.000000e-01 : f32
    %21 = vector.broadcast %cst_12 : f32 to vector<16x32xf32>
    %22 = arith.mulf %21, %20 : vector<16x32xf32>
    %cst_13 = arith.constant 4.471500e-02 : f32
    %23 = vector.broadcast %cst_13 : f32 to vector<16x32xf32>
    %24 = arith.mulf %23, %20 : vector<16x32xf32>
    %25 = arith.mulf %24, %20 : vector<16x32xf32>
    %26 = arith.mulf %25, %20 : vector<16x32xf32>
    %27 = arith.addf %20, %26 : vector<16x32xf32>
    %cst_14 = arith.constant 0.797884583 : f32
    %28 = vector.broadcast %cst_14 : f32 to vector<16x32xf32>
    %29 = arith.mulf %28, %27 : vector<16x32xf32>
    %30 = math.tanh %29 : vector<16x32xf32>
    %cst_15 = arith.constant 1.000000e+00 : f32
    %31 = vector.broadcast %cst_15 : f32 to vector<16x32xf32>
    %32 = arith.addf %31, %30 : vector<16x32xf32>
    %33 = arith.mulf %22, %32 : vector<16x32xf32>
    %34 = tpu.concatenate %33, %14 in 0 : vector<16x32xf32>, vector<1x32xf32> -> vector<17x32xf32>
    %cst_16 = arith.constant dense<0.000000e+00> : vector<16x32xf32>
    %35 = tpu.matmul %16, %34, %cst_16 {dimension_numbers = #tpu.dot_dimension_numbers<[1], [0], [0], [1], [0, 0, 1, 1], [], []>} : vector<16x17xf32>, vector<17x32xf32>, vector<16x32xf32> -> vector<16x32xf32>
    %36 = arith.addf %12, %35 : vector<16x32xf32>
    %37 = tpu.concatenate %36, %14 in 0 : vector<16x32xf32>, vector<1x32xf32> -> vector<17x32xf32>
    %cst_17 = arith.constant dense<0.000000e+00> : vector<32x32xf32>
    %38 = tpu.matmul %17, %37, %cst_17 {dimension_numbers = #tpu.dot_dimension_numbers<[1], [0], [0], [1], [0, 0, 1, 1], [], []>} : vector<32x17xf32>, vector<17x32xf32>, vector<32x32xf32> -> vector<32x32xf32>
    %cst_18 = arith.constant 5.000000e-01 : f32
    %39 = vector.broadcast %cst_18 : f32 to vector<32x32xf32>
    %40 = arith.mulf %39, %38 : vector<32x32xf32>
    %cst_19 = arith.constant 4.471500e-02 : f32
    %41 = vector.broadcast %cst_19 : f32 to vector<32x32xf32>
    %42 = arith.mulf %41, %38 : vector<32x32xf32>
    %43 = arith.mulf %42, %38 : vector<32x32xf32>
    %44 = arith.mulf %43, %38 : vector<32x32xf32>
    %45 = arith.addf %38, %44 : vector<32x32xf32>
    %cst_20 = arith.constant 0.797884583 : f32
    %46 = vector.broadcast %cst_20 : f32 to vector<32x32xf32>
    %47 = arith.mulf %46, %45 : vector<32x32xf32>
    %48 = math.tanh %47 : vector<32x32xf32>
    %cst_21 = arith.constant 1.000000e+00 : f32
    %49 = vector.broadcast %cst_21 : f32 to vector<32x32xf32>
    %50 = arith.addf %49, %48 : vector<32x32xf32>
    %51 = arith.mulf %40, %50 : vector<32x32xf32>
    %52 = tpu.concatenate %51, %14 in 0 : vector<32x32xf32>, vector<1x32xf32> -> vector<33x32xf32>
    %cst_22 = arith.constant dense<0.000000e+00> : vector<32x32xf32>
    %53 = tpu.matmul %18, %52, %cst_22 {dimension_numbers = #tpu.dot_dimension_numbers<[1], [0], [0], [1], [0, 0, 1, 1], [], []>} : vector<32x33xf32>, vector<33x32xf32>, vector<32x32xf32> -> vector<32x32xf32>
    %54 = arith.addf %11, %53 : vector<32x32xf32>
    %cst_23 = arith.constant 0.000000e+00 : f32
    %55 = vector.broadcast %cst_23 : f32 to vector<8x32xf32>
    %56 = tpu.concatenate %54, %36, %13, %55 in 0 : vector<32x32xf32>, vector<16x32xf32>, vector<8x32xf32>, vector<8x32xf32> -> vector<64x32xf32>
    %57 = arith.addf %56, %10 : vector<64x32xf32>
    %58 = vector.extract_strided_slice %7 {offsets = [0, 0], sizes = [32, 64], strides = [1, 1]} : vector<112x64xf32> to vector<32x64xf32>
    %59 = vector.extract_strided_slice %7 {offsets = [32, 0], sizes = [1, 64], strides = [1, 1]} : vector<112x64xf32> to vector<1x64xf32>
    %60 = vector.extract_strided_slice %7 {offsets = [40, 0], sizes = [64, 32], strides = [1, 1]} : vector<112x64xf32> to vector<64x32xf32>
    %61 = vector.extract_strided_slice %7 {offsets = [104, 0], sizes = [1, 32], strides = [1, 1]} : vector<112x64xf32> to vector<1x32xf32>
    %cst_24 = arith.constant dense<0.000000e+00> : vector<64x64xf32>
    %62 = tpu.matmul %57, %58, %cst_24 {dimension_numbers = #tpu.dot_dimension_numbers<[1], [0], [0], [1], [0, 0, 1, 1], [], []>} : vector<64x32xf32>, vector<32x64xf32>, vector<64x64xf32> -> vector<64x64xf32>
    %63 = vector.broadcast %59 : vector<1x64xf32> to vector<64x64xf32>
    %64 = arith.addf %62, %63 : vector<64x64xf32>
    %cst_25 = arith.constant 5.000000e-01 : f32
    %65 = vector.broadcast %cst_25 : f32 to vector<64x64xf32>
    %66 = arith.mulf %65, %64 : vector<64x64xf32>
    %cst_26 = arith.constant 4.471500e-02 : f32
    %67 = vector.broadcast %cst_26 : f32 to vector<64x64xf32>
    %68 = arith.mulf %67, %64 : vector<64x64xf32>
    %69 = arith.mulf %68, %64 : vector<64x64xf32>
    %70 = arith.mulf %69, %64 : vector<64x64xf32>
    %71 = arith.addf %64, %70 : vector<64x64xf32>
    %cst_27 = arith.constant 0.797884583 : f32
    %72 = vector.broadcast %cst_27 : f32 to vector<64x64xf32>
    %73 = arith.mulf %72, %71 : vector<64x64xf32>
    %74 = math.tanh %73 : vector<64x64xf32>
    %cst_28 = arith.constant 1.000000e+00 : f32
    %75 = vector.broadcast %cst_28 : f32 to vector<64x64xf32>
    %76 = arith.addf %75, %74 : vector<64x64xf32>
    %77 = arith.mulf %66, %76 : vector<64x64xf32>
    %cst_29 = arith.constant dense<0.000000e+00> : vector<64x32xf32>
    %78 = tpu.matmul %77, %60, %cst_29 {dimension_numbers = #tpu.dot_dimension_numbers<[1], [0], [0], [1], [0, 0, 1, 1], [], []>} : vector<64x64xf32>, vector<64x32xf32>, vector<64x32xf32> -> vector<64x32xf32>
    %79 = vector.broadcast %61 : vector<1x32xf32> to vector<64x32xf32>
    %80 = arith.addf %78, %79 : vector<64x32xf32>
    %81 = tpu.iota {dimensions = array<i32: 0>} : vector<64x32xi32>
    %c56_i32 = arith.constant 56 : i32
    %82 = vector.broadcast %c56_i32 : i32 to vector<64x32xi32>
    %83 = arith.cmpi slt, %81, %82 : vector<64x32xi32>
    %84 = arith.addf %3, %80 : vector<64x32xf32>
    %cst_30 = arith.constant 0.000000e+00 : f32
    %85 = vector.broadcast %cst_30 : f32 to vector<64x32xf32>
    %86 = arith.select %83, %84, %85 : vector<64x32xi1>, vector<64x32xf32>
    %c0_31 = arith.constant 0 : index
    %c0_32 = arith.constant 0 : index
    %87 = vector.load %arg6[%c0_31, %c0_32] : memref<64x32xf32, #tpu.memory_space<vmem>>, vector<64x32xf32>
    tpu.vector_store %arg6[%c0_31, %c0_32], %86 {strides = array<i32>} : memref<64x32xf32, #tpu.memory_space<vmem>>, vector<64x32xf32>,
    %c1_i32 = arith.constant 1 : i32
    %88 = arith.cmpi eq, %arg0, %c1_i32 : i32
    %89 = arith.extui %88 : i1 to i32
    %c0_i32_33 = arith.constant 0 : i32
    %90 = arith.cmpi ne, %89, %c0_i32_33 : i32
    scf.if %90 {
      %c0_34 = arith.constant 0 : index
      %c0_35 = arith.constant 0 : index
      %91 = vector.load %arg5[%c0_34, %c0_35] : memref<64x32xf32, #tpu.memory_space<vmem>>, vector<64x32xf32>
      tpu.vector_store %arg5[%c0_34, %c0_35], %86 {strides = array<i32>} : memref<64x32xf32, #tpu.memory_space<vmem>>, vector<64x32xf32>,
    } else {
    }
    return
  }
  func.func @transform_0(%arg0: i32) -> (i32, i32) {
    %c0_i32 = arith.constant 0 : i32
    %c0_i32_0 = arith.constant 0 : i32
    %c0_i32_1 = arith.constant 0 : i32
    return %c0_i32, %c0_i32_0 : i32, i32
  }
  func.func @transform_1(%arg0: i32) -> (i32, i32) {
    %c0_i32 = arith.constant 0 : i32
    %c0_i32_0 = arith.constant 0 : i32
    %c0_i32_1 = arith.constant 0 : i32
    return %c0_i32, %c0_i32_0 : i32, i32
  }
  func.func @transform_2(%arg0: i32) -> (i32, i32, i32) {
    %c0_i32 = arith.constant 0 : i32
    %c0_i32_0 = arith.constant 0 : i32
    %c0_i32_1 = arith.constant 0 : i32
    return %arg0, %c0_i32, %c0_i32_0 : i32, i32, i32
  }
  func.func @transform_3(%arg0: i32) -> (i32, i32, i32) {
    %c0_i32 = arith.constant 0 : i32
    %c0_i32_0 = arith.constant 0 : i32
    %c0_i32_1 = arith.constant 0 : i32
    return %arg0, %c0_i32, %c0_i32_0 : i32, i32, i32
  }
  func.func @transform_4(%arg0: i32) -> (i32, i32) {
    %c0_i32 = arith.constant 0 : i32
    %c0_i32_0 = arith.constant 0 : i32
    %c0_i32_1 = arith.constant 0 : i32
    return %c0_i32, %c0_i32_0 : i32, i32
  }
}

</mosaic_0001>

<bundles_post_ra>
// kernel: trend_pdm_stack_forward.1
= control target key start
LH: loop header
LB: loop body
LE: loop exit
PB: predicated region body
PF: predicated region fallthrough
CT: control target
= control target key end

     0   :  { %s1655_s15 = smov 0   ;;  %s1964_s0 = inlined_call_operand.vmem [shape: f32[64,32], index: 0, kind: input, shape index: {}]   ;;  %s1965_s1 = inlined_call_operand.vmem [shape: f32[64,64], index: 1, kind: input, shape index: {}]   ;;  %s1966_s2 = inlined_call_operand.vmem [shape: f32[2,96,64], index: 2, kind: input, shape index: {}]   ;;  %s1967_s3 = inlined_call_operand.vmem [shape: f32[2,112,64], index: 3, kind: input, shape index: {}]   ;;  %s1968_s4 = inlined_call_operand.vmem [shape: f32[64,32], index: 4, kind: output, shape index: {}]  }
   0x1 LB: > { %s1661_s16 = sadd.s32 4294967295, %s1624_s15   ;;  %p1270_p0 = scmp.ge.s32.totalorder %s1624_s15, 1  ;;  %s1624_s15 = sphi %s1655_s15, %s14_s15  }
   0x2   : > { %p167_p1 = scmp.lt.s32.totalorder %s1624_s15, 3 }
   0x4   : > { %p168_p2 = pnand %p1270_p0, %p167_p1 }
   0x5   : > { %p193_p3 = scmp.lt.s32.totalorder (!%p168_p2), %s1661_s16, 1  ;;  %p1273_p4 = scmp.ne.s32.totalorder (!%p168_p2), %s1661_s16, 0 }
   0x6   : > { %171 = sbr.rel (%p168_p2) target bundleno = 1680 (0x690), region = 36 }
   0xd   : > { %s194_s17 = scalar_select %p193_p3, %s1661_s16, 1 }
   0xe   : > { %206 = sbr.rel (%p1273_p4) target bundleno = 21 (0x15), region = 40  ;;  %v207_v0 = vld [vmem:[%s1964_s0] sm:$0xff] (!%p1273_p4)  ;;  %vm215_vm0 = vcmask (!%p1273_p4), 261120   ;;  %v208_v1 = vld [vmem:[%s1964_s0 + $0x8] sm:$0xff] (!%p1273_p4)  ;;  %v209_v2 = vld [vmem:[%s1964_s0 + $0x10] sm:$0xff] (!%p1273_p4) }
   0xf   : > { %s1576_s18 = smul.u32 96, %s194_s17  ;;  %216 = vst.msk [vmem:[#allocation2] sm:$0xff] (!%p1273_p4), %vm215_vm0, %v207_v0  ;;  %217 = vst.msk [vmem:[#allocation2 + $0x8] sm:$0xff] (!%p1273_p4), %vm215_vm0, %v208_v1  ;;  %v210_v3 = vld [vmem:[%s1964_s0 + $0x18] sm:$0xff] (!%p1273_p4)  ;;  %v211_v4 = vld [vmem:[%s1964_s0 + $0x20] sm:$0xff] (!%p1273_p4) }
  0x10   : > { %s1577_s19 = smul.u32 112, %s194_s17  ;;  %218 = vst.msk [vmem:[#allocation2 + $0x10] sm:$0xff] (!%p1273_p4), %vm215_vm0, %v209_v2  ;;  %v212_v5 = vld [vmem:[%s1964_s0 + $0x28] sm:$0xff] (!%p1273_p4)  ;;  %219 = vst.msk [vmem:[#allocation2 + $0x18] sm:$0xff] (!%p1273_p4), %vm215_vm0, %v210_v3  ;;  %v213_v6 = vld [vmem:[%s1964_s0 + $0x30] sm:$0xff] (!%p1273_p4) }
  0x11   : > { %s1670_s22 = scalar_lea.vmem %s1966_s2, %s1576_s18  ;;  %220 = vst.msk [vmem:[#allocation2 + $0x20] sm:$0xff] (!%p1273_p4), %vm215_vm0, %v211_v4  ;;  %221 = vst.msk [vmem:[#allocation2 + $0x28] sm:$0xff] (!%p1273_p4), %vm215_vm0, %v212_v5  ;;  %v214_v7 = vld [vmem:[%s1964_s0 + $0x38] sm:$0xff] (!%p1273_p4) }
  0x12   : > { %s1675_s25 = scalar_lea.vmem %s1967_s3, %s1577_s19  ;;  %222 = vst.msk [vmem:[#allocation2 + $0x30] sm:$0xff] (!%p1273_p4), %vm215_vm0, %v213_v6  ;;  %223 = vst.msk [vmem:[#allocation2 + $0x38] sm:$0xff] (!%p1273_p4), %vm215_vm0, %v214_v7 }
  0x15 PF: > { %vm266_vm1 = vcmask 523264   ;;  %vm839_vm2 = vcmask 261120   ;;  %v258_v17 = vld [vmem:[%s1965_s1] sm:$0xff]  ;;  %v1626_v18 = vmov 0.0   ;;  %v259_v22 = vld [vmem:[%s1965_s1 + $0x8] sm:$0xff]  ;;  %v260_v23 = vld [vmem:[%s1965_s1 + $0x10] sm:$0xff] }
  0x16   : > { %v1702_v8 = vld [vmem:[#allocation2] sm:$0xff]  ;;  %v1704_v9 = vld [vmem:[#allocation2 + $0x8] sm:$0xff]  ;;  %1402 = vmatprep.mubr.msk.f32.mxu0 %vm266_vm1, %v258_v17  ;;  %v261_v24 = vld [vmem:[%s1965_s1 + $0x18] sm:$0xff]  ;;  %vm404_vm3 = vcmask 72704   ;;  %vm411_vm4 = vcmask 1040384   ;;  %vm1627_vm5 = vmmov 1  }
  0x17   : > { %v1706_v10 = vld [vmem:[#allocation2 + $0x10] sm:$0xff]  ;;  %v1506_v11 = vpack.c.bf16 %v1704_v9, %v1702_v8  ;;  %v1710_v12 = vld [vmem:[#allocation2 + $0x18] sm:$0xff]  ;;  %v262_v25 = vld [vmem:[%s1965_s1 + $0x20] sm:$0xff]  ;;  %v1628_v38 = vmov 1.0   ;;  %vm508_vm7 = vcmask 138240   ;;  %vm725_vm8 = vcmask 269312  }
  0x18   : > { %v1712_v13 = vld [vmem:[#allocation2 + $0x20] sm:$0xff]  ;;  %v1510_v14 = vpack.c.bf16 %v1710_v12, %v1706_v10  ;;  %v1716_v15 = vld [vmem:[#allocation2 + $0x28] sm:$0xff]  ;;  %v264_v27 = vld [vmem:[%s1965_s1 + $0x30] sm:$0xff]  ;;  %p1314_p5 = scmp.ne.s32.totalorder %s1661_s16, 1 }
  0x19   : > { %v1718_v16 = vld [vmem:[#allocation2 + $0x38] sm:$0xff]  ;;  %1507 = vmatprep.subr.bf16.mxu0 %v1506_v11  ;;  %v1514_v19 = vpack.c.bf16 %v1716_v15, %v1712_v13  ;;  %v1727_v20 = vld [vmem:[#allocation2 + $0x30] sm:$0xff]  ;;  %v263_v26 = vld [vmem:[%s1965_s1 + $0x28] sm:$0xff] }
  0x1a   : > { %1214 = vst.msk [vmem:[#allocation2 + $0x38] sm:$0xff] %vm839_vm2, %v1626_v18  ;;  %1509 = vmatpush3.bf16.msra.mxu0 %v1506_v11  ;;  %v1518_v21 = vpack.c.bf16 %v1718_v16, %v1727_v20  ;;  %v265_v28 = vld [vmem:[%s1965_s1 + $0x38] sm:$0xff]  ;;  %v232_v29 = vld [vmem:[%s1670_s22] sm:$0xff]  ;;  %vm1523_vm6 = vmpackc.low %vm411_vm4, %vm1627_vm5 }
  0x1b   : > { %1511 = vmatprep.subr.bf16.mxu0 %v1510_v14  ;;  %1418 = vmatprep.mubr.msk.f32.mxu1 %vm404_vm3, %v232_v29  ;;  %v233_v40 = vld [vmem:[%s1670_s22 + $0x8] sm:$0xff]  ;;  %v234_v41 = vld [vmem:[%s1670_s22 + $0x10] sm:$0xff]  ;;  %v235_v63 = vld [vmem:[%s1670_s22 + $0x18] sm:$0xff] }
  0x1c   : > { %v236_v0 = vld [vmem:[%s1670_s22 + $0x20] sm:$0xff]  ;;  %v237_v17 = vld [vmem:[%s1670_s22 + $0x28] sm:$0xff]  ;;  %v238_v18 = vld [vmem:[%s1670_s22 + $0x30] sm:$0xff] }
  0x1e   : > { %1513 = vmatpush3.bf16.msra.mxu0 %v1510_v14 }
  0x1f   : > { %1515 = vmatprep.subr.bf16.mxu0 %v1514_v19 }
  0x22   : > { %1517 = vmatpush3.bf16.msra.mxu0 %v1514_v19  ;;  %v239_v19 = vld [vmem:[%s1670_s22 + $0x38] sm:$0xff] }
  0x23   : > { %1519 = vmatprep.subr.bf16.mxu0 %v1518_v21 }
  0x26   : > { %1521 = vmatpush3.bf16.msra.mxu0 %v1518_v21  ;;  %v240_v21 = vld [vmem:[%s1670_s22 + $0x40] sm:$0xff] }
  0x29   : > { %1403 = vmatmul.mubr.msk.f32.vlgmr.msra.gmra.mrb[0].mxu0 %vm266_vm1, %v259_v22  ;;  %v244_v22 = vld [vmem:[%s1675_s25] sm:$0xff] }
  0x2a   : > { %1405 = vmatprep.mubr.msk.f32.mxu0 %vm266_vm1, %v260_v23  ;;  %v245_v23 = vld [vmem:[%s1675_s25 + $0x8] sm:$0xff] }
  0x2d   : > { %1406 = vmatmul.mubr.msk.f32.gmra.mrb[2].mxu0 %vm266_vm1, %v261_v24  ;;  %v246_v24 = vld [vmem:[%s1675_s25 + $0x10] sm:$0xff] }
  0x2e   : > { %1408 = vmatprep.mubr.msk.f32.mxu0 %vm266_vm1, %v262_v25  ;;  %v1544_v25 = vpack.c.bf16 %v245_v23, %v244_v22  ;;  %v241_v23 = vld [vmem:[%s1670_s22 + $0x48] sm:$0xff] }
  0x30   : > { %1545 = vmatprep.subr.bf16.mxu0 %v1544_v25 }
  0x31   : > { %1409 = vmatmul.mubr.msk.f32.gmra.mrb[4].mxu0 %vm266_vm1, %v263_v26  ;;  %v247_v26 = vld [vmem:[%s1675_s25 + $0x18] sm:$0xff] }
  0x32   : > { %1411 = vmatprep.mubr.msk.f32.mxu0 %vm266_vm1, %v264_v27  ;;  %v1548_v27 = vpack.c.bf16 %v247_v26, %v246_v24  ;;  %1547 = vmatpush3.bf16.msra.mxu0 %v1544_v25  ;;  %v242_v24 = vld [vmem:[%s1670_s22 + $0x50] sm:$0xff]  ;;  %v243_v25 = vld [vmem:[%s1670_s22 + $0x58] sm:$0xff] }
  0x34   : > { %1549 = vmatprep.subr.bf16.mxu0 %v1548_v27 }
  0x35   : > { %1412 = vmatmul.mubr.msk.f32.gmra.mrb[6].mxu0 %vm266_vm1, %v265_v28 }
  0x36   : > { %1551 = vmatpush3.bf16.msra.mxu0 %v1548_v27 }
  0xfc   : > { %v1761_v30 = vpop.f32.mrb[0].mxu0 }
  0xfd   : > { %v1763_v31 = vpop.f32.mrb[1].mxu0  ;;  %v397_v27 = vsub.f32 %v1704_v9, %v1761_v30 }
 0x100   : > { %v1765_v32 = vpop.f32.mrb[2].mxu0 }
 0x101   : > { %v1767_v33 = vpop.f32.mrb[3].mxu0 }
 0x104   : > { %v1410_v34 = vpop.f32.mrb[4].mxu0 }
 0x105   : > { %v377_v35 = vpop.f32.mrb[5].mxu0  ;;  %v401_v2 = vsub.f32 %v1716_v15, %v1410_v34 }
 0x106   : > { %v400_v5 = vsub.f32 %v1712_v13, %v377_v35 }
 0x108   : > { %v1769_v36 = vpop.f32.mrb[6].mxu0 }
 0x109   : > { %v1771_v37 = vpop.f32.mrb[7].mxu0 }
 0x10a   : > { %v1522_v39 = vpack.c.bf16 %v1628_v38, %v1771_v37 }
 0x10c   : > { %1524 = vmatprep.subr.msk.bf16.mxu1 %vm1523_vm6, %v1522_v39 }
 0x10d   : > { %1527 = vmatpush3.bf16.msk.msra.mxu1 %vm1523_vm6, %v1522_v39 }
 0x110   : > { %1419 = vmatmul.mubr.msk.f32.vlgmr.msra.gmra.mrb[0].mxu1 %vm404_vm3, %v233_v40 }
 0x111   : > { %1427 = vmatprep.mubr.msk.f32.mxu1 %vm508_vm7, %v234_v41 }
 0x1e3   : > { %v1420_v42 = vpop.f32.mrb[0].mxu1 }
 0x1e4   : > { %v493_v43 = vmul.f32 0.044715, %v1420_v42  ;;  %v481_v44 = vpop.f32.mrb[1].mxu1  ;;  %v491_v56 = vmul.f32 0.5, %v1420_v42 }
 0x1e5   : > { %v492_v45 = vmul.f32 0.044715, %v481_v44  ;;  %v490_v58 = vmul.f32 0.5, %v481_v44 }
 0x1e6   : > { %v495_v46 = vmul.f32 %v1420_v42, %v493_v43 }
 0x1e7   : > { %v494_v47 = vmul.f32 %v492_v45, %v481_v44 }
 0x1e8   : > { %v497_v48 = vmul.f32 %v1420_v42, %v495_v46 }
 0x1e9   : > { %v496_v49 = vmul.f32 %v494_v47, %v481_v44 }
 0x1ea   : > { %v499_v50 = vadd.f32 %v1420_v42, %v497_v48 }
 0x1eb   : > { %v498_v51 = vadd.f32 %v496_v49, %v481_v44 }
 0x1ec   : > { %v501_v52 = vmul.f32 0.7978846, %v499_v50 }
 0x1ed   : > { %v500_v53 = vmul.f32 0.7978846, %v498_v51 }
 0x1ee   : > { %1590 = vtanh.f32 %v501_v52 }
 0x1ef   : > { %1592 = vtanh.f32 %v500_v53 }
 0x1f8   : > { %v1591_v54 = vpop.eup %1590 }
 0x1f9   : > { %v1593_v55 = vpop.eup %1592  ;;  %v505_v57 = vadd.f32 1.0, %v1591_v54 }
 0x1fa   : > { %v504_v59 = vadd.f32 1.0, %v1593_v55 }
 0x1fb   : > { %v507_v60 = vmul.f32 %v505_v57, %v491_v56 }
 0x1fc   : > { %v506_v61 = vmul.f32 %v504_v59, %v490_v58 }
 0x1fe   : > { %v1528_v62 = vpack.c.bf16 %v507_v60, %v506_v61 }
 0x200   : > { %1529 = vmatprep.subr.bf16.mxu1 %v1528_v62 }
 0x201   : > { %1531 = vmatpush3.bf16.msra.mxu1 %v1528_v62 }
 0x202   : > { %1425 = vmatprep.subr.msk.mxu1 %vm411_vm4, %v1628_v38 }
 0x205   : > { %1426 = vmatpush3.msk.msra.mxu1 %vm411_vm4, %v1628_v38 }
 0x206   : > { %1428 = vmatmul.mubr.msk.f32.vlgmr.msra.gmra.mrb[2].mxu1 %vm508_vm7, %v235_v63 }
 0x207   : > { %1436 = vmatprep.mubr.msk.f32.mxu1 %vm508_vm7, %v236_v0 }
 0x2d9   : > { %v1429_v1 = vpop.f32.mrb[2].mxu1 }
 0x2da   : > { %v591_v3 = vadd.f32 %v1429_v1, %v1410_v34  ;;  %v581_v4 = vpop.f32.mrb[3].mxu1 }
 0x2db   : > { %v590_v6 = vadd.f32 %v581_v4, %v377_v35 }
 0x2dc   : > { %v1790_v7 = vadd.f32 %v591_v3, %v401_v2 }
 0x2dd   : > { %v1532_v11 = vpack.c.bf16 %v591_v3, %v590_v6  ;;  %v1792_v14 = vadd.f32 %v590_v6, %v400_v5 }
 0x2df   : > { %1533 = vmatprep.subr.bf16.mxu1 %v1532_v11 }
 0x2e0   : > { %1535 = vmatpush3.bf16.msra.mxu1 %v1532_v11 }
 0x2e1   : > { %1434 = vmatprep.subr.msk.mxu1 %vm411_vm4, %v1628_v38 }
 0x2e4   : > { %1435 = vmatpush3.msk.msra.mxu1 %vm411_vm4, %v1628_v38 }
 0x2e5   : > { %1437 = vmatmul.mubr.msk.f32.vlgmr.msra.gmra.mrb[4].mxu1 %vm508_vm7, %v237_v17 }
 0x2e6   : > { %1439 = vmatprep.mubr.msk.f32.mxu1 %vm508_vm7, %v238_v18 }
 0x2e9   : > { %1440 = vmatmul.mubr.msk.f32.gmra.mrb[6].mxu1 %vm508_vm7, %v239_v19 }
 0x2ea   : > { %1452 = vmatprep.mubr.msk.f32.mxu1 %vm725_vm8, %v240_v21 }
 0x3b8   : > { %v1438_v28 = vpop.f32.mrb[4].mxu1 }
 0x3b9   : > { %v694_v29 = vmul.f32 0.044715, %v1438_v28  ;;  %v670_v34 = vpop.f32.mrb[5].mxu1  ;;  %v690_v61 = vmul.f32 0.5, %v1438_v28 }
 0x3ba   : > { %v693_v35 = vmul.f32 0.044715, %v670_v34  ;;  %v689_v63 = vmul.f32 0.5, %v670_v34 }
 0x3bb   : > { %v698_v39 = vmul.f32 %v1438_v28, %v694_v29 }
 0x3bc   : > { %v697_v40 = vmul.f32 %v693_v35, %v670_v34  ;;  %v1441_v41 = vpop.f32.mrb[6].mxu1 }
 0x3bd   : > { %v702_v42 = vmul.f32 %v1438_v28, %v698_v39  ;;  %v696_v43 = vmul.f32 0.044715, %v1441_v41  ;;  %v680_v44 = vpop.f32.mrb[7].mxu1  ;;  %v692_v5 = vmul.f32 0.5, %v1441_v41 }
 0x3be   : > { %v701_v45 = vmul.f32 %v697_v40, %v670_v34  ;;  %v695_v46 = vmul.f32 0.044715, %v680_v44  ;;  %v691_v17 = vmul.f32 0.5, %v680_v44 }
 0x3bf   : > { %v706_v47 = vadd.f32 %v1438_v28, %v702_v42  ;;  %v700_v48 = vmul.f32 %v1441_v41, %v696_v43 }
 0x3c0   : > { %v705_v49 = vadd.f32 %v701_v45, %v670_v34  ;;  %v699_v50 = vmul.f32 %v695_v46, %v680_v44  ;;  %v396_v34 = vsub.f32 %v1702_v8, %v1763_v31  ;;  %v402_v46 = vsub.f32 %v1727_v20, %v1771_v37 }
 0x3c1   : > { %v710_v51 = vmul.f32 0.7978846, %v706_v47  ;;  %v704_v52 = vmul.f32 %v1441_v41, %v700_v48  ;;  %v249_v47 = vld [vmem:[%s1675_s25 + $0x28] sm:$0xff]  ;;  %v250_v48 = vld [vmem:[%s1675_s25 + $0x30] sm:$0xff] }
 0x3c2   : > { %v709_v53 = vmul.f32 0.7978846, %v705_v49  ;;  %v703_v54 = vmul.f32 %v699_v50, %v680_v44  ;;  %v1552_v49 = vpack.c.bf16 %v250_v48, %v249_v47  ;;  %v253_v50 = vld [vmem:[%s1675_s25 + $0x48] sm:$0xff] }
 0x3c3   : > { %1594 = vtanh.f32 %v710_v51  ;;  %v708_v55 = vadd.f32 %v1441_v41, %v704_v52  ;;  %v399_v41 = vsub.f32 %v1710_v12, %v1765_v32  ;;  %v255_v51 = vld [vmem:[%s1675_s25 + $0x58] sm:$0xff]  ;;  %v256_v52 = vld [vmem:[%s1675_s25 + $0x60] sm:$0xff] }
 0x3c4   : > { %1596 = vtanh.f32 %v709_v53  ;;  %v707_v56 = vadd.f32 %v703_v54, %v680_v44  ;;  %v398_v44 = vsub.f32 %v1706_v10, %v1767_v33  ;;  %1553 = vmatprep.subr.bf16.mxu0 %v1552_v49  ;;  %v1564_v53 = vpack.c.bf16 %v256_v52, %v255_v51 }
 0x3c5   : > { %v712_v57 = vmul.f32 0.7978846, %v708_v55  ;;  %v835_v54 = vlaneseq }
 0x3c6   : > { %v711_v58 = vmul.f32 0.7978846, %v707_v56 }
 0x3c7   : > { %1598 = vtanh.f32 %v712_v57  ;;  %v1855_v55 = vshrl.u32 %v835_v54, 7  ;;  %v248_v57 = vld [vmem:[%s1675_s25 + $0x20] sm:$0xff] }
 0x3c8   : > { %1600 = vtanh.f32 %v711_v58 }
 0x3c9   : > { %v837_v56 = vsub.s32 0, %v1855_v55 }
 0x3cb   : > { %v838_v58 = vrot.slane %v248_v57, %v837_v56 }
 0x3cd   : > { %v1595_v59 = vpop.eup %1594 }
 0x3ce   : > { %v1597_v60 = vpop.eup %1596  ;;  %v718_v62 = vadd.f32 1.0, %v1595_v59 }
 0x3cf   : > { %v717_v0 = vadd.f32 1.0, %v1597_v60 }
 0x3d0   : > { %v722_v1 = vmul.f32 %v718_v62, %v690_v61 }
 0x3d1   : > { %v1599_v2 = vpop.eup %1598  ;;  %v721_v3 = vmul.f32 %v717_v0, %v689_v63 }
 0x3d2   : > { %v1601_v4 = vpop.eup %1600  ;;  %v720_v6 = vadd.f32 1.0, %v1599_v2 }
 0x3d3   : > { %v1536_v11 = vpack.c.bf16 %v722_v1, %v721_v3  ;;  %v719_v18 = vadd.f32 1.0, %v1601_v4 }
 0x3d4   : > { %v724_v19 = vmul.f32 %v720_v6, %v692_v5 }
 0x3d5   : > { %1537 = vmatprep.subr.bf16.mxu1 %v1536_v11  ;;  %v723_v21 = vmul.f32 %v719_v18, %v691_v17 }
 0x3d6   : > { %1539 = vmatpush3.bf16.msra.mxu1 %v1536_v11 }
 0x3d7   : > { %v1540_v22 = vpack.c.bf16 %v724_v19, %v723_v21 }
 0x3d9   : > { %1541 = vmatprep.subr.bf16.mxu1 %v1540_v22 }
 0x3da   : > { %1543 = vmatpush3.bf16.msra.mxu1 %v1540_v22 }
 0x3db   : > { %1450 = vmatprep.subr.msk.mxu1 %vm411_vm4, %v1628_v38 }
 0x3de   : > { %1451 = vmatpush3.msk.msra.mxu1 %vm411_vm4, %v1628_v38 }
 0x3df   : > { %1453 = vmatmul.mubr.msk.f32.vlgmr.msra.gmra.mrb[8].mxu1 %vm725_vm8, %v241_v23  ;;  %1568 = vmatprep.subr.bf16.mxu1 %v1552_v49 }
 0x3e0   : > { %1455 = vmatprep.mubr.msk.f32.mxu1 %vm725_vm8, %v242_v24  ;;  %1572 = vmatpush3.bf16.msra.mxu1 %v1552_v49 }
 0x3e3   : > { %1456 = vmatmul.mubr.msk.f32.gmra.mrb[10].mxu1 %vm725_vm8, %v243_v25 }
 0x4b2   : > { %v1454_v26 = vpop.f32.mrb[8].mxu1 }
 0x4b3   : > { %v824_v28 = vadd.f32 %v1454_v26, %v1761_v30  ;;  %v804_v29 = vpop.f32.mrb[9].mxu1 }
 0x4b4   : > { %v823_v35 = vadd.f32 %v804_v29, %v1763_v31 }
 0x4b5   : > { %v828_v38 = vadd.f32 %v824_v28, %v397_v27 }
 0x4b6   : > { %v827_v39 = vadd.f32 %v823_v35, %v396_v34  ;;  %v1457_v40 = vpop.f32.mrb[10].mxu1 }
 0x4b7   : > { %v826_v42 = vadd.f32 %v1457_v40, %v1765_v32  ;;  %v814_v43 = vpop.f32.mrb[11].mxu1  ;;  %v833_v32 = vadd.f32 %v402_v46, %v1771_v37  ;;  %v251_v37 = vld [vmem:[%s1675_s25 + $0x38] sm:$0xff] }
 0x4b8   : > { %v825_v30 = vadd.f32 %v814_v43, %v1767_v33  ;;  %1466 = vmatprep.mubr.msk.f32.mxu0 %vm839_vm2, %v827_v39  ;;  %v403_v33 = vsub.f32 %v1718_v16, %v1769_v36  ;;  %v254_v16 = vld [vmem:[%s1675_s25 + $0x50] sm:$0xff] }
 0x4b9   : > { %v830_v45 = vadd.f32 %v826_v42, %v399_v41  ;;  %1467 = vmatmul.mubr.msk.f32.vlgmr.msra.gmra.mrb[8].mxu0 %vm839_vm2, %v828_v38  ;;  %v1560_v36 = vpack.c.bf16 %v254_v16, %v253_v50 }
 0x4ba   : > { %v829_v31 = vadd.f32 %v825_v30, %v398_v44  ;;  %1555 = vmatpush3.bf16.msra.mxu0 %v1552_v49 }
 0x4bc   : > { %1469 = vmatprep.mubr.msk.f32.mxu0 %vm839_vm2, %v829_v31 }
 0x4bd   : > { %1470 = vmatmul.mubr.msk.f32.gmra.mrb[10].mxu0 %vm839_vm2, %v830_v45 }
 0x4be   : > { %1472 = vmatprep.mubr.msk.f32.mxu0 %vm839_vm2, %v1792_v14  ;;  %v252_v14 = vld [vmem:[%s1675_s25 + $0x40] sm:$0xff] }
 0x4c1   : > { %1473 = vmatmul.mubr.msk.f32.gmra.mrb[12].mxu0 %vm839_vm2, %v1790_v7  ;;  %v1556_v7 = vpack.c.bf16 %v252_v14, %v251_v37 }
 0x4c2   : > { %1475 = vmatprep.mubr.msk.f32.mxu0 %vm839_vm2, %v833_v32 }
 0x4c3   : > { %1557 = vmatprep.subr.bf16.mxu0 %v1556_v7  ;;  %1569 = vmatprep.subr.bf16.mxu1 %v1556_v7 }
 0x4c4   : > { %1559 = vmatpush3.bf16.msra.mxu0 %v1556_v7  ;;  %1573 = vmatpush3.bf16.msra.mxu1 %v1556_v7 }
 0x4c5   : > { %1476 = vmatmul.mubr.msk.f32.gmra.mrb[14].mxu0 %vm839_vm2, %v403_v33  ;;  %1561 = vmatprep.subr.bf16.mxu0 %v1560_v36 }
 0x4c6   : > { %1570 = vmatprep.subr.bf16.mxu1 %v1560_v36 }
 0x4c8   : > { %1563 = vmatpush3.bf16.msra.mxu0 %v1560_v36  ;;  %1574 = vmatpush3.bf16.msra.mxu1 %v1560_v36 }
 0x4c9   : > { %1565 = vmatprep.subr.bf16.mxu0 %v1564_v53  ;;  %1571 = vmatprep.subr.bf16.mxu1 %v1564_v53 }
 0x4cc   : > { %1567 = vmatpush3.bf16.msra.mxu0 %v1564_v53  ;;  %1575 = vmatpush3.bf16.msra.mxu1 %v1564_v53 }
 0x58c   : > { %v1468_v59 = vpop.f32.mrb[8].mxu0 }
 0x58d   : > { %v1861_v60 = vadd.f32 %v1468_v59, %v838_v58  ;;  %v930_v61 = vpop.f32.mrb[9].mxu0 }
 0x58e   : > { %v931_v62 = vadd.f32 %v930_v61, %v838_v58 }
 0x58f   : > { %v978_v63 = vmul.f32 0.044715, %v1861_v60 }
 0x590   : > { %v977_v0 = vmul.f32 0.044715, %v931_v62  ;;  %v1471_v1 = vpop.f32.mrb[10].mxu0 }
 0x591   : > { %v986_v2 = vmul.f32 %v978_v63, %v1861_v60  ;;  %v1865_v3 = vadd.f32 %v1471_v1, %v838_v58  ;;  %v940_v4 = vpop.f32.mrb[11].mxu0  ;;  %v969_v1 = vmul.f32 0.5, %v931_v62 }
 0x592   : > { %v985_v5 = vmul.f32 %v977_v0, %v931_v62  ;;  %v1867_v6 = vadd.f32 %v940_v4, %v838_v58  ;;  %v970_v4 = vmul.f32 0.5, %v1861_v60 }
 0x593   : > { %v994_v11 = vmul.f32 %v986_v2, %v1861_v60  ;;  %v980_v17 = vmul.f32 0.044715, %v1865_v3 }
 0x594   : > { %v993_v18 = vmul.f32 %v985_v5, %v931_v62  ;;  %v979_v19 = vmul.f32 0.044715, %v1867_v6  ;;  %v1474_v21 = vpop.f32.mrb[12].mxu0 }
 0x595   : > { %v1002_v22 = vadd.f32 %v994_v11, %v1861_v60  ;;  %v988_v23 = vmul.f32 %v980_v17, %v1865_v3  ;;  %v1874_v24 = vadd.f32 %v1474_v21, %v838_v58  ;;  %v950_v25 = vpop.f32.mrb[13].mxu0  ;;  %v971_v21 = vmul.f32 0.5, %v1867_v6 }
 0x596   : > { %v1001_v26 = vadd.f32 %v993_v18, %v931_v62  ;;  %v987_v27 = vmul.f32 %v979_v19, %v1867_v6  ;;  %v1877_v28 = vadd.f32 %v950_v25, %v838_v58 }
 0x597   : > { %v1010_v29 = vmul.f32 0.7978846, %v1002_v22  ;;  %v996_v34 = vmul.f32 %v988_v23, %v1865_v3  ;;  %v982_v35 = vmul.f32 0.044715, %v1874_v24  ;;  %v972_v23 = vmul.f32 0.5, %v1865_v3 }
 0x598   : > { %v995_v38 = vmul.f32 %v987_v27, %v1867_v6  ;;  %v981_v39 = vmul.f32 0.044715, %v1877_v28  ;;  %v1477_v40 = vpop.f32.mrb[14].mxu0  ;;  %v1009_v41 = vmul.f32 0.7978846, %v1001_v26 }
 0x599   : > { %1602 = vtanh.f32 %v1010_v29  ;;  %v1004_v42 = vadd.f32 %v996_v34, %v1865_v3  ;;  %v990_v43 = vmul.f32 %v982_v35, %v1874_v24  ;;  %v1885_v44 = vadd.f32 %v1477_v40, %v838_v58  ;;  %v960_v30 = vpop.f32.mrb[15].mxu0 }
 0x59a   : > { %v1003_v45 = vadd.f32 %v995_v38, %v1867_v6  ;;  %v989_v31 = vmul.f32 %v981_v39, %v1877_v28  ;;  %v961_v46 = vadd.f32 %v960_v30, %v838_v58  ;;  %1604 = vtanh.f32 %v1009_v41 }
 0x59b   : > { %v1012_v32 = vmul.f32 0.7978846, %v1004_v42  ;;  %v998_v33 = vmul.f32 %v990_v43, %v1874_v24  ;;  %v984_v47 = vmul.f32 0.044715, %v1885_v44  ;;  %v973_v29 = vmul.f32 0.5, %v1877_v28 }
 0x59c   : > { %v997_v48 = vmul.f32 %v989_v31, %v1877_v28  ;;  %v983_v49 = vmul.f32 0.044715, %v961_v46  ;;  %v1011_v37 = vmul.f32 0.7978846, %v1003_v45  ;;  %v974_v6 = vmul.f32 0.5, %v1874_v24 }
 0x59d   : > { %1606 = vtanh.f32 %v1012_v32  ;;  %v1006_v14 = vadd.f32 %v998_v33, %v1874_v24  ;;  %v992_v7 = vmul.f32 %v984_v47, %v1885_v44  ;;  %v975_v41 = vmul.f32 0.5, %v961_v46  ;;  %v257_v24 = vld [vmem:[%s1675_s25 + $0x68] sm:$0xff] }
 0x59e   : > { %v1005_v50 = vadd.f32 %v997_v48, %v1877_v28  ;;  %v991_v16 = vmul.f32 %v983_v49, %v961_v46  ;;  %1608 = vtanh.f32 %v1011_v37  ;;  %v976_v43 = vmul.f32 0.5, %v1885_v44 }
 0x59f   : > { %v1000_v36 = vmul.f32 %v992_v7, %v1885_v44  ;;  %v1014_v51 = vmul.f32 0.7978846, %v1006_v14  ;;  %v1044_v45 = vrot.slane %v257_v24, %v837_v56 }
 0x5a0   : > { %v999_v52 = vmul.f32 %v991_v16, %v961_v46  ;;  %v1013_v53 = vmul.f32 0.7978846, %v1005_v50 }
 0x5a1   : > { %v1008_v54 = vadd.f32 %v1000_v36, %v1885_v44  ;;  %1610 = vtanh.f32 %v1014_v51 }
 0x5a2   : > { %v1007_v57 = vadd.f32 %v999_v52, %v961_v46  ;;  %1612 = vtanh.f32 %v1013_v53 }
 0x5a3   : > { %v1603_v58 = vpop.eup %1602  ;;  %v1016_v59 = vmul.f32 0.7978846, %v1008_v54 }
 0x5a4   : > { %v1605_v61 = vpop.eup %1604  ;;  %v1026_v63 = vadd.f32 1.0, %v1603_v58  ;;  %v1015_v0 = vmul.f32 0.7978846, %v1007_v57 }
 0x5a5   : > { %v1025_v2 = vadd.f32 1.0, %v1605_v61  ;;  %1614 = vtanh.f32 %v1016_v59 }
 0x5a6   : > { %1616 = vtanh.f32 %v1015_v0  ;;  %v1034_v18 = vmul.f32 %v1026_v63, %v970_v4 }
 0x5a7   : > { %v1607_v5 = vpop.eup %1606  ;;  %v1033_v11 = vmul.f32 %v1025_v2, %v969_v1 }
 0x5a8   : > { %v1609_v17 = vpop.eup %1608  ;;  %v1028_v19 = vadd.f32 1.0, %v1607_v5 }
 0x5a9   : > { %1494 = vmatprep.mubr.msk.f32.mxu0 %vm266_vm1, %v1033_v11  ;;  %v1027_v22 = vadd.f32 1.0, %v1609_v17 }
 0x5aa   : > { %1495 = vmatmul.mubr.msk.f32.vlgmr.msra.gmra.mrb[16].mxu0 %vm266_vm1, %v1034_v18  ;;  %v1036_v27 = vmul.f32 %v1028_v19, %v972_v23 }
 0x5ab   : > { %v1611_v62 = vpop.eup %1610  ;;  %v1035_v25 = vmul.f32 %v1027_v22, %v971_v21 }
 0x5ac   : > { %v1613_v26 = vpop.eup %1612  ;;  %v1030_v60 = vadd.f32 1.0, %v1611_v62 }
 0x5ad   : > { %1497 = vmatprep.mubr.msk.f32.mxu1 %vm266_vm1, %v1035_v25  ;;  %v1029_v34 = vadd.f32 1.0, %v1613_v26 }
 0x5ae   : > { %1498 = vmatmul.mubr.msk.f32.vlgmr.msra.gmra.mrb[12].mxu1 %vm266_vm1, %v1036_v27  ;;  %v1038_v39 = vmul.f32 %v1030_v60, %v974_v6 }
 0x5af   : > { %v1615_v35 = vpop.eup %1614  ;;  %v1037_v38 = vmul.f32 %v1029_v34, %v973_v29 }
 0x5b0   : > { %v1617_v3 = vpop.eup %1616  ;;  %v1032_v40 = vadd.f32 1.0, %v1615_v35 }
 0x5b1   : > { %1500 = vmatprep.mubr.msk.f32.mxu1 %vm266_vm1, %v1037_v38  ;;  %v1031_v42 = vadd.f32 1.0, %v1617_v3 }
 0x5b2   : > { %1501 = vmatmul.mubr.msk.f32.gmra.mrb[14].mxu1 %vm266_vm1, %v1038_v39  ;;  %v1040_v30 = vmul.f32 %v1032_v40, %v976_v43 }
 0x5b3   : > { %v1039_v28 = vmul.f32 %v1031_v42, %v975_v41 }
 0x5b5   : > { %1503 = vmatprep.mubr.msk.f32.mxu1 %vm266_vm1, %v1039_v28 }
 0x5b6   : > { %1504 = vmatmul.mubr.msk.f32.gmra.mrb[16].mxu1 %vm266_vm1, %v1040_v30 }
 0x67d   : > { %v1496_v31 = vpop.f32.mrb[16].mxu0 }
 0x67e   : > { %v1141_v32 = vadd.f32 %v1496_v31, %v1044_v45  ;;  %v1135_v33 = vpop.f32.mrb[17].mxu0 }
 0x67f   : > { %v1136_v47 = vadd.f32 %v1135_v33, %v1044_v45 }
 0x680   : > { %v1192_v46 = vadd.f32 %v1141_v32, %v1704_v9 }
 0x681   : > { %v1191_v48 = vadd.f32 %v1136_v47, %v1702_v8  ;;  %v1499_v49 = vpop.f32.mrb[12].mxu1 }
 0x682   : > { %1208 = vst.msk [vmem:[#allocation2 + $0x8] sm:$0xff] %vm839_vm2, %v1192_v46  ;;  %v1151_v44 = vadd.f32 %v1499_v49, %v1044_v45  ;;  %v1145_v37 = vpop.f32.mrb[13].mxu1  ;;  %1220 = vst.msk [vmem:[%s1968_s4 + $0x8] sm:$0xff] (!%p1314_p5), %vm839_vm2, %v1192_v46 }
 0x683   : > { %1207 = vst.msk [vmem:[#allocation2] sm:$0xff] %vm839_vm2, %v1191_v48  ;;  %v1146_v14 = vadd.f32 %v1145_v37, %v1044_v45  ;;  %1219 = vst.msk [vmem:[%s1968_s4] sm:$0xff] (!%p1314_p5), %vm839_vm2, %v1191_v48 }
 0x684   : > { %v1194_v7 = vadd.f32 %v1151_v44, %v1710_v12 }
 0x685   : > { %v1193_v55 = vadd.f32 %v1146_v14, %v1706_v10  ;;  %v1502_v56 = vpop.f32.mrb[14].mxu1 }
 0x686   : > { %1210 = vst.msk [vmem:[#allocation2 + $0x18] sm:$0xff] %vm839_vm2, %v1194_v7  ;;  %v1161_v50 = vadd.f32 %v1502_v56, %v1044_v45  ;;  %v1155_v16 = vpop.f32.mrb[15].mxu1  ;;  %1222 = vst.msk [vmem:[%s1968_s4 + $0x18] sm:$0xff] (!%p1314_p5), %vm839_vm2, %v1194_v7 }
 0x687   : > { %1209 = vst.msk [vmem:[#allocation2 + $0x10] sm:$0xff] %vm839_vm2, %v1193_v55  ;;  %v1156_v8 = vadd.f32 %v1155_v16, %v1044_v45  ;;  %1221 = vst.msk [vmem:[%s1968_s4 + $0x10] sm:$0xff] (!%p1314_p5), %vm839_vm2, %v1193_v55 }
 0x688   : > { %v1196_v9 = vadd.f32 %v1161_v50, %v1716_v15 }
 0x689   : > { %v1195_v36 = vadd.f32 %v1156_v8, %v1712_v13  ;;  %v1505_v51 = vpop.f32.mrb[16].mxu1  ;;  %1218 = sbr.rel (%p1314_p5) target bundleno = 1680 (0x690), region = 44  ;;  %v1629_v13 = vmov (!%p1314_p5), 0.0  }
 0x68a   : > { %1212 = vst.msk [vmem:[#allocation2 + $0x28] sm:$0xff] %vm839_vm2, %v1196_v9  ;;  %v1165_v52 = vpop.f32.mrb[17].mxu1  ;;  %1224 = vst.msk [vmem:[%s1968_s4 + $0x28] sm:$0xff] (!%p1314_p5), %vm839_vm2, %v1196_v9 }
 0x68b   : > { %1211 = vst.msk [vmem:[#allocation2 + $0x20] sm:$0xff] %vm839_vm2, %v1195_v36  ;;  %v1166_v12 = vadd.f32 %v1165_v52, %v1044_v45  ;;  %1223 = vst.msk [vmem:[%s1968_s4 + $0x20] sm:$0xff] (!%p1314_p5), %vm839_vm2, %v1195_v36 }
 0x68c   : > { %1226 = vst.msk [vmem:[%s1968_s4 + $0x38] sm:$0xff] (!%p1314_p5), %vm839_vm2, %v1629_v13 }
 0x68d   : > { %v1197_v10 = vadd.f32 %v1166_v12, %v1727_v20 }
 0x68f   : > { %1213 = vst.msk [vmem:[#allocation2 + $0x30] sm:$0xff] %vm839_vm2, %v1197_v10  ;;  %1225 = vst.msk [vmem:[%s1968_s4 + $0x30] sm:$0xff] (!%p1314_p5), %vm839_vm2, %v1197_v10 }
 0x690 PF: > { %s14_s15 = sadd.s32 1, %s1624_s15  }
 0x691   : > { %p11_p6 = scmp.ge.s32.totalorder %s14_s15, 4  }
 0x693   :  { %13 = sbr.rel (!%p11_p6) target bundleno = 1 (0x1), region = 73 }

</bundles_post_ra>
